<compile_context>
chip_gen: v5e
topology: v5e:2x2
jax: 0.10.0
libtpu: 0.0.40
codegen_flags: <defaults>
</compile_context>

<pallas_src>
import functools

import jax
import jax.numpy as jnp
from jax.experimental import pallas as pl
from jax.experimental.pallas import tpu as pltpu

BETA = 5.0
LANES = 128
CHUNK_ROWS = 1024          # inner accumulation chunk (f32: 512 KiB per temp)


def _tpu_vmem_capacity_bytes():
    try:
        return int(pltpu.get_tpu_info().vmem_capacity_bytes)
    except Exception:
        return 0


def _num_core_splits():
    """Shard the reduction across TensorCores only on 2-TC chips (v7x)."""
    try:
        info = pltpu.get_tpu_info()
        for attr in ("num_cores", "num_tensorcores", "tensorcore_count",
                     "core_count"):
            n = getattr(info, attr, None)
            if isinstance(n, int) and n >= 1:
                return min(n, 2)
    except Exception:
        pass
    try:
        kind = jax.devices()[0].device_kind.lower()
        if "v7" in kind or "tpu7" in kind:
            return 2
    except Exception:
        pass
    return 1                 # v5e / v6e (single TensorCore) and safe fallback


def _target_block_bytes():
    """~Constant input bytes per pipeline step, sized to the chip's VMEM."""
    cap = _tpu_vmem_capacity_bytes()
    if cap >= (100 << 20):   # v5e / v6e: 128 MiB physical VMEM
        return 8 << 20
    return 4 << 20           # v7x (64 MiB physical VMEM) and fallback


def _vmem_limit_bytes():
    """Explicit scoped-VMEM limit: above the 16/32 MiB defaults, below phys."""
    limit = 48 << 20
    cap = _tpu_vmem_capacity_bytes()
    if cap:
        limit = min(limit, (cap * 3) // 4)
    return limit


def _wmse_kernel(x_ref, y_ref, o_ref, acc_ref, *,
                 rows_valid, block_rows, chunk_rows, tiles_per_core,
                 needs_mask):
    # Zero the per-core accumulator at the start of this core's reduction.
    @pl.when(pl.program_id(1) == 0)
    def _():
        acc_ref[...] = jnp.zeros_like(acc_ref)

    # Intended (unclamped) global block index for this (core, step); the
    # index_map clamps, the mask below zeroes any over-coverage contribution.
    blk = pl.program_id(0) * tiles_per_core + pl.program_id(1)
    row0_block = blk * block_rows
    n_chunks = block_rows // chunk_rows

    def add_chunk(row0, xa, ya, masked):
        # Diff / square in f32 regardless of input dtype (matches reference).
        d = xa.astype(jnp.float32) - ya.astype(jnp.float32)
        sq = d * d
        if masked:
            row_ids = jax.lax.broadcasted_iota(jnp.int32, sq.shape, 0) + row0
            # Select (NOT multiply-by-mask): over-read rows may hold arbitrary
            # garbage (NaN/Inf) that must not poison the sum.
            sq = jnp.where(row_ids < rows_valid, sq, 0.0)
        cr = sq.shape[0]
        if cr % 8 == 0:
            # Keep the accumulator vreg-shaped: elementwise VPU adds only.
            acc_ref[...] += sq.reshape(cr // 8, 8, LANES).sum(axis=0)
        else:
            # Small / oddly-shaped full-array block fallback.
            acc_ref[0:1, :] += jnp.sum(sq, axis=0, keepdims=True)

    def accumulate(masked):
        if n_chunks <= 1:
            add_chunk(row0_block, x_ref[...], y_ref[...], masked)
        else:
            # Chunked accumulation bounds VMEM live ranges of d / sq temps.
            def body(ci, carry):
                r0 = pl.multiple_of(ci * chunk_rows, chunk_rows)
                add_chunk(row0_block + r0,
                          x_ref[pl.ds(r0, chunk_rows), :],
                          y_ref[pl.ds(r0, chunk_rows), :],
                          masked)
                return carry
            jax.lax.fori_loop(0, n_chunks, body, 0, unroll=True)

    if needs_mask:
        # Pay for iota/compare/select only on blocks that can touch the
        # invalid tail (or fully over-coverage steps); interior blocks take
        # the mask-free fast path.
        is_edge = row0_block + block_rows > rows_valid

        @pl.when(jnp.logical_not(is_edge))
        def _():
            accumulate(masked=False)

        @pl.when(is_edge)
        def _():
            accumulate(masked=True)
    else:
        accumulate(masked=False)

    # Finalize: single cross-lane reduce, write this core's partial sum.
    @pl.when(pl.program_id(1) == pl.num_programs(1) - 1)
    def _():
        o_ref[...] = jnp.sum(acc_ref[...]).reshape(1, 1, 1)


def weighted_mse_loss(x, y):
    assert x.shape == y.shape, (x.shape, y.shape)
    total_n = x.size

    xf = x.reshape(-1)
    yf = y.reshape(-1)

    # TODO(synk): when numel % 128 != 0 this concat is an extra full HBM
    # read+write of both tensors; a 1-D BlockSpec + in-kernel lane mask would
    # avoid it. Typical NCHW shapes (and the test below) take the no-copy path.
    pad = (-total_n) % LANES
    if pad:
        xf = jnp.concatenate([xf, jnp.zeros((pad,), xf.dtype)])
        yf = jnp.concatenate([yf, jnp.zeros((pad,), yf.dtype)])

    rows = xf.size // LANES
    x2d = xf.reshape(rows, LANES)
    y2d = yf.reshape(rows, LANES)

    itemsize = jnp.dtype(x.dtype).itemsize
    # Byte-based block sizing: ~constant input bytes per step across dtypes;
    # block_rows stays a multiple of CHUNK_ROWS (itself a multiple of 8/16/32
    # for sublane packing) unless the whole array fits in a single block.
    target_rows = max(CHUNK_ROWS, _target_block_bytes() // (LANES * itemsize))
    block_rows = rows if rows <= target_rows else target_rows
    chunk_rows = CHUNK_ROWS if block_rows % CHUNK_ROWS == 0 else block_rows

    n_tiles = pl.cdiv(rows, block_rows)
    num_splits = _num_core_splits()
    if n_tiles < num_splits:
        num_splits = 1          # never duplicate DMA work for tiny inputs
    tiles_per_core = pl.cdiv(n_tiles, num_splits)
    # Mask only when (cores x tiles x block) coverage is not exactly `rows`.
    needs_mask = (num_splits * tiles_per_core * block_rows) != rows

    kernel = functools.partial(
        _wmse_kernel,
        rows_valid=rows,
        block_rows=block_rows,
        chunk_rows=chunk_rows,
        tiles_per_core=tiles_per_core,
        needs_mask=needs_mask,
    )

    def in_map(c, k):
        # Clamp so over-coverage steps re-read the last valid block; their
        # contribution is zeroed by the in-kernel row mask.
        return (jnp.minimum(c * tiles_per_core + k, n_tiles - 1), 0)

    partials = pl.pallas_call(
        kernel,
        out_shape=jax.ShapeDtypeStruct((num_splits, 1, 1), jnp.float32),
        grid_spec=pltpu.PrefetchScalarGridSpec(
            num_scalar_prefetch=0,
            grid=(num_splits, tiles_per_core),
            in_specs=[
                pl.BlockSpec((block_rows, LANES), in_map),
                pl.BlockSpec((block_rows, LANES), in_map),
            ],
            out_specs=pl.BlockSpec((1, 1, 1), lambda c, k: (c, 0, 0)),
            scratch_shapes=[pltpu.VMEM((8, LANES), jnp.float32)],
        ),
        compiler_params=pltpu.CompilerParams(
            # TODO(synk): on v7x, verify in xprof that this "parallel" axis
            # engages both TensorCores; if not, switch to pltpu.CORE_PARALLEL
            # (the per-core acc scratch and (c,0,0) output stay valid).
            dimension_semantics=("parallel", "arbitrary"),
            vmem_limit_bytes=_vmem_limit_bytes(),
        ),
        cost_estimate=pl.CostEstimate(
            flops=3 * total_n,
            transcendentals=0,
            bytes_accessed=2 * total_n * itemsize,
        ),
    )(x2d, y2d)

    scale = (BETA * BETA) / float(total_n)
    return jnp.sum(partials) * scale


if __name__ == "__main__":
    key = jax.random.PRNGKey(0)
    kx, ky = jax.random.split(key)
    x = jax.random.normal(kx, (2, 4, 16, 16), dtype=jnp.float32)
    y = jax.random.normal(ky, (2, 4, 16, 16), dtype=jnp.float32)

    loss = weighted_mse_loss(x, y)
    jax.block_until_ready(loss)

    # Reference check (plain JAX).
    ref = jnp.mean(((x - y) * BETA) ** 2)
    assert jnp.allclose(loss, ref, rtol=1e-5, atol=1e-5), (loss, ref)

    print("KERNEL_OK")
</pallas_src>

<mosaic_0001>
module attributes {stable_mosaic.version = 11 : i64} {
  func.func @_wmse_kernel(%arg0: i32, %arg1: i32, %arg2: memref<16x128xf32, #tpu.memory_space<vmem>>, %arg3: memref<16x128xf32, #tpu.memory_space<vmem>>, %arg4: memref<1x1x1xf32, #tpu.memory_space<vmem>>, %arg5: memref<8x128xf32, #tpu.memory_space<vmem>>) attributes {dimension_semantics = [#tpu.dimension_semantics<parallel>, #tpu.dimension_semantics<arbitrary>], iteration_bounds = array<i64: 1, 1>, scalar_prefetch = 0 : i64, scratch_operands = 1 : i64, tpu.core_type = #tpu.core_type<tc>, window_params = [{transform_indices = @transform_0, window_bounds = array<i64: 16, 128>}, {transform_indices = @transform_1, window_bounds = array<i64: 16, 128>}, {transform_indices = @transform_2, window_bounds = array<i64: 1, 1, 1>}]} {
    %c0_i32 = arith.constant 0 : i32
    %0 = arith.cmpi eq, %arg1, %c0_i32 : i32
    %1 = arith.extui %0 : i1 to i32
    %c0_i32_0 = arith.constant 0 : i32
    %2 = arith.cmpi ne, %1, %c0_i32_0 : i32
    scf.if %2 {
      %cst_10 = arith.constant 0.000000e+00 : f32
      %15 = vector.broadcast %cst_10 : f32 to vector<8x128xf32>
      %c0_11 = arith.constant 0 : index
      %c0_12 = arith.constant 0 : index
      %16 = vector.load %arg5[%c0_11, %c0_12] : memref<8x128xf32, #tpu.memory_space<vmem>>, vector<8x128xf32>
      tpu.vector_store %arg5[%c0_11, %c0_12], %15 {strides = array<i32>} : memref<8x128xf32, #tpu.memory_space<vmem>>, vector<8x128xf32>,
    } else {
    }
    %c0 = arith.constant 0 : index
    %c0_1 = arith.constant 0 : index
    %3 = vector.load %arg2[%c0, %c0_1] : memref<16x128xf32, #tpu.memory_space<vmem>>, vector<16x128xf32>
    %c0_2 = arith.constant 0 : index
    %c0_3 = arith.constant 0 : index
    %4 = vector.load %arg3[%c0_2, %c0_3] : memref<16x128xf32, #tpu.memory_space<vmem>>, vector<16x128xf32>
    %5 = arith.subf %3, %4 : vector<16x128xf32>
    %6 = arith.mulf %5, %5 : vector<16x128xf32>
    %c0_4 = arith.constant 0 : index
    %c0_5 = arith.constant 0 : index
    %7 = vector.load %arg5[%c0_4, %c0_5] : memref<8x128xf32, #tpu.memory_space<vmem>>, vector<8x128xf32>
    %8 = vector.shape_cast %6 : vector<16x128xf32> to vector<2x8x128xf32>
    %cst = arith.constant dense<0.000000e+00> : vector<8x128xf32>
    %9 = vector.multi_reduction <add>, %8, %cst [0] : vector<2x8x128xf32> to vector<8x128xf32>
    %10 = arith.addf %7, %9 : vector<8x128xf32>
    %c0_6 = arith.constant 0 : index
    %c0_7 = arith.constant 0 : index
    %11 = vector.load %arg5[%c0_6, %c0_7] : memref<8x128xf32, #tpu.memory_space<vmem>>, vector<8x128xf32>
    tpu.vector_store %arg5[%c0_6, %c0_7], %10 {strides = array<i32>} : memref<8x128xf32, #tpu.memory_space<vmem>>, vector<8x128xf32>,
    %c0_i32_8 = arith.constant 0 : i32
    %12 = arith.cmpi eq, %arg1, %c0_i32_8 : i32
    %13 = arith.extui %12 : i1 to i32
    %c0_i32_9 = arith.constant 0 : i32
    %14 = arith.cmpi ne, %13, %c0_i32_9 : i32
    scf.if %14 {
      %c0_10 = arith.constant 0 : index
      %c0_11 = arith.constant 0 : index
      %15 = vector.load %arg5[%c0_10, %c0_11] : memref<8x128xf32, #tpu.memory_space<vmem>>, vector<8x128xf32>
      %16 = vector.shape_cast %15 : vector<8x128xf32> to vector<1x8x128xf32>
      %cst_12 = arith.constant dense<0.000000e+00> : vector<1xf32>
      %17 = vector.multi_reduction <add>, %16, %cst_12 [1, 2] : vector<1x8x128xf32> to vector<1xf32>
      %18 = vector.shape_cast %17 : vector<1xf32> to vector<1x1x1xf32>
      %19 = vector.extract %18[0, 0, 0] : f32 from vector<1x1x1xf32>
      %20 = vector.broadcast %19 : f32 to vector<1x1x1xf32>
      %c0_13 = arith.constant 0 : index
      %c0_14 = arith.constant 0 : index
      %c0_15 = arith.constant 0 : index
      %21 = vector.load %arg4[%c0_13, %c0_14, %c0_15] : memref<1x1x1xf32, #tpu.memory_space<vmem>>, vector<1x1x1xf32>
      tpu.vector_store %arg4[%c0_13, %c0_14, %c0_15], %20 {strides = array<i32>} : memref<1x1x1xf32, #tpu.memory_space<vmem>>, vector<1x1x1xf32>,
    } else {
    }
    return
  }
  func.func @transform_0(%arg0: i32, %arg1: i32) -> (i32, i32) {
    %c1_i32 = arith.constant 1 : i32
    %0 = arith.muli %arg0, %c1_i32 : i32
    %1 = arith.addi %0, %arg1 : i32
    %c0_i32 = arith.constant 0 : i32
    %2 = arith.minsi %1, %c0_i32 : i32
    %c0_i32_0 = arith.constant 0 : i32
    %c0_i32_1 = arith.constant 0 : i32
    return %2, %c0_i32_0 : i32, i32
  }
  func.func @transform_1(%arg0: i32, %arg1: i32) -> (i32, i32) {
    %c1_i32 = arith.constant 1 : i32
    %0 = arith.muli %arg0, %c1_i32 : i32
    %1 = arith.addi %0, %arg1 : i32
    %c0_i32 = arith.constant 0 : i32
    %2 = arith.minsi %1, %c0_i32 : i32
    %c0_i32_0 = arith.constant 0 : i32
    %c0_i32_1 = arith.constant 0 : i32
    return %2, %c0_i32_0 : i32, i32
  }
  func.func @transform_2(%arg0: i32, %arg1: i32) -> (i32, i32, i32) {
    %c0_i32 = arith.constant 0 : i32
    %c0_i32_0 = arith.constant 0 : i32
    %c0_i32_1 = arith.constant 0 : i32
    return %arg0, %c0_i32, %c0_i32_0 : i32, i32, i32
  }
}

</mosaic_0001>

<bundles_post_ra>
// kernel: tpu_custom_call.1
= control target key start
LH: loop header
LB: loop body
LE: loop exit
PB: predicated region body
PF: predicated region fallthrough
CT: control target
= control target key end

     0   :  { %7 = vsyncpa [#allocation4], 0  ;;  %s233_s0 = inlined_call_operand.hbm [shape: f32[16,128], index: 0, kind: input, shape index: {}]   ;;  %s234_s1 = inlined_call_operand.hbm [shape: f32[16,128], index: 1, kind: input, shape index: {}]   ;;  %s235_s2 = inlined_call_operand.hbm [shape: f32[1,1,1], index: 2, kind: output, shape index: {}]  }
   0x1   :  { %8 = vsyncpa [#allocation7], 0 }
   0x2   :  { %9 = vsyncpa [#allocation5], 0  ;;  %s20_s11 = sshll.u32 %s233_s0, 4  ;;  %s204_s12 = smov [#allocation3]   ;;  %s21_s11 = int_to_ptr.hbm [resolvable:$true] %s20_s11 }
   0x3   :  { %s22_s13 = sshll.u32 %s204_s12, 4  ;;  %s39_s16 = sshll.u32 %s234_s1, 4  ;;  %s23_s13 = int_to_ptr.vmem [resolvable:$true] %s22_s13  ;;  %s40_s16 = int_to_ptr.hbm [resolvable:$true] %s39_s16 }
   0x4   :  { %s205_s17 = smov 128   ;;  %s206_s18 = smov 8  }
   0x5   :  { %28 = dma.hbm_to_vmem [thread:$0]  %s21_s11, 256, %s23_s13, [#allocation4], %s205_s17, %s205_s17, %s206_s18  }
   0x6   :  { %s207_s19 = smov [#allocation6]  }
   0x7   :  { %s41_s20 = sshll.u32 %s207_s19, 4  ;;  %s42_s20 = int_to_ptr.vmem [resolvable:$true] %s41_s20 }
   0x8   :  { %47 = dma.hbm_to_vmem [thread:$0]  %s40_s16, 256, %s42_s20, [#allocation7], %s205_s17, %s205_s17, %s206_s18  }
   0x9   :  { %198 = dma.done.wait [#allocation4], 256  }
   0xa   :  { %199 = vsyncadd [#allocation4], 4294967040 }
   0xb   :  { %200 = dma.done.wait [#allocation7], 256  }
   0xc   :  { %201 = vsyncadd [#allocation7], 4294967040  ;;  %v69_v0 = vld [vmem:[#allocation3] sm:$0xff]  ;;  %v70_v1 = vld [vmem:[#allocation3 + $0x8] sm:$0xff]  ;;  %s208_s0 = smov [#allocation8]   ;;  %s104_s23 = sshll.u32 %s235_s2, 4  ;;  %s105_s23 = int_to_ptr.hbm [resolvable:$true] %s104_s23 }
   0xd   :  { %v71_v2 = vld [vmem:[#allocation6] sm:$0xff]  ;;  %v72_v3 = vld [vmem:[#allocation6 + $0x8] sm:$0xff]  ;;  %s102_s1 = sshll.u32 %s208_s0, 4  ;;  %vm95_vm0 = vcmask 0   ;;  %s103_s1 = int_to_ptr.vmem [resolvable:$true] %s102_s1 }
   0xe   :  { %v73_v4 = vsub.f32 %v69_v0, %v71_v2  ;;  %v74_v5 = vsub.f32 %v70_v1, %v72_v3 }
  0x10   :  { %v75_v6 = vmul.f32 %v73_v4, %v73_v4  ;;  %v76_v7 = vmul.f32 %v74_v5, %v74_v5 }
  0x12   :  { %v78_v8 = vadd.f32 %v76_v7, %v75_v6 }
  0x14   :  { %85 = vadd.xlane.f32.xlu0 %v78_v8 }
  0x87   :  { %v86_v9 = vpop.xlane.xlu0 %85 }
  0x88   :  { %v87_v10 = vrot.slane %v86_v9, 4 }
  0x8a   :  { %v88_v11 = vadd.f32 %v87_v10, %v86_v9 }
  0x8c   :  { %v89_v12 = vrot.slane %v88_v11, 2 }
  0x8e   :  { %v90_v13 = vadd.f32 %v89_v12, %v88_v11 }
  0x90   :  { %v91_v14 = vrot.slane %v90_v13, 1 }
  0x92   :  { %v92_v15 = vadd.f32 %v91_v14, %v90_v13 }
  0x94   :  { %119 = vpush %v92_v15 }
  0xc5   :  { %s120_s24 = spop %119 }
  0xc6   :  { %v94_v16 = vstv %s120_s24 }
  0xc7   :  { %96 = vst.msk [vmem:[#allocation8] sm:$0x1] %vm95_vm0, %v94_v16 }
  0xc8   :  { %107 = dma.vmem_to_hbm [thread:$0]  %s103_s1, 16, %s105_s23, [#allocation5]  }
  0xc9   :  { %202 = dma.done.wait [#allocation5], 16  }
  0xca   :  { %203 = vsyncadd [#allocation5], 4294967280 }
  0xcb   :  { %112 = vsyncpa [#allocation4], 1 }
  0xcc   :  { %113 = vsyncpa [#allocation7], 1 }
  0xcd   :  { %114 = vsyncpa [#allocation5], 1 }

</bundles_post_ra>
